<compile_context>
chip_gen: v6e
topology: v6e:2x2x1
jax: 0.10.0
libtpu: 0.0.40
codegen_flags: <defaults>
</compile_context>

<pallas_src>
import functools

import jax
import jax.numpy as jnp
from jax.experimental import pallas as pl
from jax.experimental.pallas import tpu as pltpu


# ----------------------------------------------------------------------------
# Fused Pallas kernel: block1 -> block2 -> block3 of DenseGCNNblock
#   per block:  R = ReLU( BN( sum_k adj_k @ X_b @ W_k + sum_k b_k ) )
# ----------------------------------------------------------------------------
def _fused_kernel(x_ref, a1_ref, w1_ref, p1_ref,
                  a2_ref, w2_ref, p2_ref,
                  a3_ref, w3_ref, p3_ref,
                  o_ref, *, bn_rows, k_terms):

    def dcdgcn(x_bf, a_ref, w_ref, p_ref):
        # Stage 1: node mix with batch + K folded into one matmul.
        #   a_ref: (K*B*N, B*N) = vstack_k(kron(I_B, adj_k)), bf16
        #   x_bf : (B*N, Cin), bf16
        h = jnp.dot(a_ref[...], x_bf, preferred_element_type=jnp.float32)
        h = h.astype(jnp.bfloat16)                       # (K*B*N, Cin)

        # Stage 2: channel transform + K reduction (sublane-aligned slices).
        r = jnp.dot(h[0:bn_rows, :], w_ref[0],
                    preferred_element_type=jnp.float32)  # (B*N, Cout)
        for k in range(1, k_terms):
            r = r + jnp.dot(h[k * bn_rows:(k + 1) * bn_rows, :], w_ref[k],
                            preferred_element_type=jnp.float32)

        # bias + BatchNorm2d (training-mode stats over B*N rows) + ReLU, f32.
        p = p_ref[...]                                   # (3, Cout): bias/gamma/beta
        r = r + p[0:1, :]
        mean = jnp.mean(r, axis=0, keepdims=True)
        var = jnp.mean((r - mean) ** 2, axis=0, keepdims=True)
        rn = (r - mean) * jax.lax.rsqrt(var + 1e-5)
        rn = rn * p[1:2, :] + p[2:3, :]
        return jnp.maximum(rn, 0.0)

    h1 = dcdgcn(x_ref[...], a1_ref, w1_ref, p1_ref)
    h2 = dcdgcn(h1.astype(jnp.bfloat16), a2_ref, w2_ref, p2_ref)
    h3 = dcdgcn(h2.astype(jnp.bfloat16), a3_ref, w3_ref, p3_ref)
    o_ref[...] = h3


def fused_dense_gcnn_pallas(x, a1, w1, p1, a2, w2, p2, a3, w3, p3,
                            *, batch, nodes, k_terms):
    bn_rows = batch * nodes
    cout3 = w3.shape[-1]
    kernel = functools.partial(_fused_kernel, bn_rows=bn_rows, k_terms=k_terms)

    def full(arr):
        return pl.BlockSpec(arr.shape, lambda i, _nd=arr.ndim: (0,) * _nd)

    return pl.pallas_call(
        kernel,
        out_shape=jax.ShapeDtypeStruct((bn_rows, cout3), jnp.float32),
        grid_spec=pltpu.PrefetchScalarGridSpec(
            num_scalar_prefetch=0,
            grid=(1,),
            in_specs=[full(x),
                      full(a1), full(w1), full(p1),
                      full(a2), full(w2), full(p2),
                      full(a3), full(w3), full(p3)],
            out_specs=pl.BlockSpec((bn_rows, cout3), lambda i: (0, 0)),
        ),
        compiler_params=pltpu.CompilerParams(
            dimension_semantics=("arbitrary",)),
    )(x, a1, w1, p1, a2, w2, p2, a3, w3, p3)


# ----------------------------------------------------------------------------
# Plain-JAX glue (parameter prep, adjacency normalization, reference)
# ----------------------------------------------------------------------------
def normalize_A(A):
    A = jnp.maximum(A, 0.0)
    d = jnp.sum(A, axis=1)
    d_inv_sqrt = 1.0 / jnp.sqrt(d + 1e-10)
    return A * d_inv_sqrt[:, None] * d_inv_sqrt[None, :]


def generate_cheby_adj(L, K):
    support = [jnp.eye(L.shape[-1], dtype=L.dtype)]
    if K > 1:
        support.append(L)
    for _ in range(2, K):
        support.append(support[-1] @ L)
    return jnp.stack(support[:K], axis=0)


def init_dcdgcn_params(key, num_nodes, cin, K, cout):
    kA, kW, kb = jax.random.split(key, 3)
    # xavier_normal_ for A
    A = jax.random.normal(kA, (num_nodes, num_nodes), jnp.float32) * jnp.sqrt(
        2.0 / (num_nodes + num_nodes))
    W = jax.random.normal(kW, (K, cin, cout), jnp.float32) / jnp.sqrt(cin)
    b = jax.random.normal(kb, (K, cout), jnp.float32) * 0.01
    gamma = jnp.ones((cout,), jnp.float32)
    beta = jnp.zeros((cout,), jnp.float32)
    return dict(A=A, W=W, b=b, gamma=gamma, beta=beta)


def _prep_block(p, K, B):
    """Precompute kernel inputs for one DCDGCN block (plain JAX, outside kernel)."""
    L = normalize_A(p["A"])
    adj = generate_cheby_adj(L, K)                       # (K, N, N)
    N = adj.shape[-1]
    eye_b = jnp.eye(B, dtype=adj.dtype)
    # A_big[k*B*N + b*N + n, b*N + m] = adj[k, n, m]   (block-diag over batch,
    # stacked over K) -> one matmul does all batches and all Chebyshev terms.
    a_bd = jnp.einsum("pq,knm->kpnqm", eye_b, adj)       # (K, B, N, B, N)
    a_big = a_bd.reshape(K * B * N, B * N).astype(jnp.bfloat16)
    w = p["W"].astype(jnp.bfloat16)                      # (K, Cin, Cout)
    pvec = jnp.stack([jnp.sum(p["b"], axis=0), p["gamma"], p["beta"]],
                     axis=0).astype(jnp.float32)         # (3, Cout)
    return a_big, w, pvec


def dense_gcnn_block(params, x_nchw, K):
    # x_nchw: (B, Cin, N, 1)
    B, Cin, N, _ = x_nchw.shape
    x_flat = jnp.transpose(x_nchw[..., 0], (0, 2, 1)).reshape(B * N, Cin)

    a1, w1, p1 = _prep_block(params["block1"], K, B)
    a2, w2, p2 = _prep_block(params["block2"], K, B)
    a3, w3, p3 = _prep_block(params["block3"], K, B)

    h3 = fused_dense_gcnn_pallas(x_flat.astype(jnp.bfloat16),
                                 a1, w1, p1, a2, w2, p2, a3, w3, p3,
                                 batch=B, nodes=N, k_terms=K)
    cout3 = w3.shape[-1]
    h_nchw = jnp.transpose(h3.reshape(B, N, cout3), (0, 2, 1))[..., None]
    return jnp.concatenate([x_nchw, h_nchw], axis=1)     # dense concat on C


# ------------------------------ reference (f32) ------------------------------
def dcdgcn_ref(params, x_bnc, K):
    L = normalize_A(params["A"])
    adj = generate_cheby_adj(L, K)
    r = jnp.zeros((x_bnc.shape[0], x_bnc.shape[1], params["W"].shape[-1]),
                  jnp.float32)
    for k in range(K):
        h = jnp.einsum("mn,bnc->bmc", adj[k], x_bnc)
        r = r + jnp.einsum("bmc,co->bmo", h, params["W"][k]) + params["b"][k]
    mean = jnp.mean(r, axis=(0, 1), keepdims=True)
    var = jnp.mean((r - mean) ** 2, axis=(0, 1), keepdims=True)
    rn = (r - mean) * jax.lax.rsqrt(var + 1e-5)
    rn = rn * params["gamma"] + params["beta"]
    return jnp.maximum(rn, 0.0)


def dense_gcnn_block_ref(params, x_nchw, K):
    x_bnc = jnp.transpose(x_nchw[..., 0], (0, 2, 1))
    h = dcdgcn_ref(params["block1"], x_bnc, K)
    h = dcdgcn_ref(params["block2"], h, K)
    h = dcdgcn_ref(params["block3"], h, K)
    h_nchw = jnp.transpose(h, (0, 2, 1))[..., None]
    return jnp.concatenate([x_nchw, h_nchw], axis=1)


# ----------------------------------------------------------------------------
if __name__ == "__main__":
    B = 2
    num_nodes = 16
    in_num_layers = 32
    out_num_layers = 8
    K = 3
    # dropout=0.0 -> no dropout layers (matches module when dropout == 0)

    key = jax.random.PRNGKey(0)
    kx, k1, k2, k3 = jax.random.split(key, 4)

    params = {
        "block1": init_dcdgcn_params(k1, num_nodes, in_num_layers, K,
                                     in_num_layers // 2),
        "block2": init_dcdgcn_params(k2, num_nodes, in_num_layers // 2, K,
                                     in_num_layers // 2),
        "block3": init_dcdgcn_params(k3, num_nodes, in_num_layers // 2, K,
                                     out_num_layers),
    }

    x = jax.random.normal(kx, (B, in_num_layers, num_nodes, 1), jnp.float32)

    fwd = jax.jit(dense_gcnn_block, static_argnums=2)
    out = jax.block_until_ready(fwd(params, x, K))

    ref = jax.block_until_ready(dense_gcnn_block_ref(params, x, K))
    assert out.shape == (B, in_num_layers + out_num_layers, num_nodes, 1)
    # bf16 matmul operands (f32 accumulation) -> slightly relaxed tolerance.
    assert jnp.allclose(out, ref, rtol=5e-2, atol=5e-2), "mismatch vs reference"

    print("KERNEL_OK")
</pallas_src>

<mosaic_0001>
module attributes {stable_mosaic.version = 11 : i64} {
  func.func @_fused_kernel(%arg0: i32, %arg1: memref<32x32xbf16, #tpu.memory_space<vmem>>, %arg2: memref<96x32xbf16, #tpu.memory_space<vmem>>, %arg3: memref<3x32x16xbf16, #tpu.memory_space<vmem>>, %arg4: memref<3x16xf32, #tpu.memory_space<vmem>>, %arg5: memref<96x32xbf16, #tpu.memory_space<vmem>>, %arg6: memref<3x16x16xbf16, #tpu.memory_space<vmem>>, %arg7: memref<3x16xf32, #tpu.memory_space<vmem>>, %arg8: memref<96x32xbf16, #tpu.memory_space<vmem>>, %arg9: memref<3x16x8xbf16, #tpu.memory_space<vmem>>, %arg10: memref<3x8xf32, #tpu.memory_space<vmem>>, %arg11: memref<32x8xf32, #tpu.memory_space<vmem>>) attributes {dimension_semantics = [#tpu.dimension_semantics<arbitrary>], iteration_bounds = array<i64: 1>, scalar_prefetch = 0 : i64, scratch_operands = 0 : i64, tpu.core_type = #tpu.core_type<tc>, window_params = [{pipeline_mode = #tpu.pipeline_mode<synchronous>, transform_indices = @transform_0, window_bounds = array<i64: 32, 32>}, {pipeline_mode = #tpu.pipeline_mode<synchronous>, transform_indices = @transform_1, window_bounds = array<i64: 96, 32>}, {pipeline_mode = #tpu.pipeline_mode<synchronous>, transform_indices = @transform_2, window_bounds = array<i64: 3, 32, 16>}, {pipeline_mode = #tpu.pipeline_mode<synchronous>, transform_indices = @transform_3, window_bounds = array<i64: 3, 16>}, {pipeline_mode = #tpu.pipeline_mode<synchronous>, transform_indices = @transform_4, window_bounds = array<i64: 96, 32>}, {pipeline_mode = #tpu.pipeline_mode<synchronous>, transform_indices = @transform_5, window_bounds = array<i64: 3, 16, 16>}, {pipeline_mode = #tpu.pipeline_mode<synchronous>, transform_indices = @transform_6, window_bounds = array<i64: 3, 16>}, {pipeline_mode = #tpu.pipeline_mode<synchronous>, transform_indices = @transform_7, window_bounds = array<i64: 96, 32>}, {pipeline_mode = #tpu.pipeline_mode<synchronous>, transform_indices = @transform_8, window_bounds = array<i64: 3, 16, 8>}, {pipeline_mode = #tpu.pipeline_mode<synchronous>, transform_indices = @transform_9, window_bounds = array<i64: 3, 8>}, {pipeline_mode = #tpu.pipeline_mode<synchronous>, transform_indices = @transform_10, window_bounds = array<i64: 32, 8>}]} {
    %c0 = arith.constant 0 : index
    %c0_0 = arith.constant 0 : index
    %0 = vector.load %arg1[%c0, %c0_0] : memref<32x32xbf16, #tpu.memory_space<vmem>>, vector<32x32xbf16>
    %c0_1 = arith.constant 0 : index
    %c0_2 = arith.constant 0 : index
    %1 = vector.load %arg2[%c0_1, %c0_2] : memref<96x32xbf16, #tpu.memory_space<vmem>>, vector<96x32xbf16>
    %cst = arith.constant dense<0.000000e+00> : vector<96x32xf32>
    %2 = tpu.matmul %1, %0, %cst {dimension_numbers = #tpu.dot_dimension_numbers<[1], [0], [0], [1], [0, 0, 1, 1], [], []>} : vector<96x32xbf16>, vector<32x32xbf16>, vector<96x32xf32> -> vector<96x32xf32>
    %3 = arith.truncf %2 : vector<96x32xf32> to vector<96x32xbf16>
    %4 = vector.extract_strided_slice %3 {offsets = [0, 0], sizes = [32, 32], strides = [1, 1]} : vector<96x32xbf16> to vector<32x32xbf16>
    %c0_3 = arith.constant 0 : index
    %c0_4 = arith.constant 0 : index
    %c0_5 = arith.constant 0 : index
    %5 = vector.load %arg3[%c0_3, %c0_4, %c0_5] : memref<3x32x16xbf16, #tpu.memory_space<vmem>>, vector<1x32x16xbf16>
    %6 = vector.shape_cast %5 : vector<1x32x16xbf16> to vector<32x16xbf16>
    %cst_6 = arith.constant dense<0.000000e+00> : vector<32x16xf32>
    %7 = tpu.matmul %4, %6, %cst_6 {dimension_numbers = #tpu.dot_dimension_numbers<[1], [0], [0], [1], [0, 0, 1, 1], [], []>} : vector<32x32xbf16>, vector<32x16xbf16>, vector<32x16xf32> -> vector<32x16xf32>
    %8 = vector.extract_strided_slice %3 {offsets = [32, 0], sizes = [32, 32], strides = [1, 1]} : vector<96x32xbf16> to vector<32x32xbf16>
    %c1 = arith.constant 1 : index
    %c0_7 = arith.constant 0 : index
    %c0_8 = arith.constant 0 : index
    %9 = vector.load %arg3[%c1, %c0_7, %c0_8] : memref<3x32x16xbf16, #tpu.memory_space<vmem>>, vector<1x32x16xbf16>
    %10 = vector.shape_cast %9 : vector<1x32x16xbf16> to vector<32x16xbf16>
    %cst_9 = arith.constant dense<0.000000e+00> : vector<32x16xf32>
    %11 = tpu.matmul %8, %10, %cst_9 {dimension_numbers = #tpu.dot_dimension_numbers<[1], [0], [0], [1], [0, 0, 1, 1], [], []>} : vector<32x32xbf16>, vector<32x16xbf16>, vector<32x16xf32> -> vector<32x16xf32>
    %12 = arith.addf %7, %11 : vector<32x16xf32>
    %13 = vector.extract_strided_slice %3 {offsets = [64, 0], sizes = [32, 32], strides = [1, 1]} : vector<96x32xbf16> to vector<32x32xbf16>
    %c2 = arith.constant 2 : index
    %c0_10 = arith.constant 0 : index
    %c0_11 = arith.constant 0 : index
    %14 = vector.load %arg3[%c2, %c0_10, %c0_11] : memref<3x32x16xbf16, #tpu.memory_space<vmem>>, vector<1x32x16xbf16>
    %15 = vector.shape_cast %14 : vector<1x32x16xbf16> to vector<32x16xbf16>
    %cst_12 = arith.constant dense<0.000000e+00> : vector<32x16xf32>
    %16 = tpu.matmul %13, %15, %cst_12 {dimension_numbers = #tpu.dot_dimension_numbers<[1], [0], [0], [1], [0, 0, 1, 1], [], []>} : vector<32x32xbf16>, vector<32x16xbf16>, vector<32x16xf32> -> vector<32x16xf32>
    %17 = arith.addf %12, %16 : vector<32x16xf32>
    %c0_13 = arith.constant 0 : index
    %c0_14 = arith.constant 0 : index
    %18 = vector.load %arg4[%c0_13, %c0_14] : memref<3x16xf32, #tpu.memory_space<vmem>>, vector<3x16xf32>
    %19 = vector.extract_strided_slice %18 {offsets = [0, 0], sizes = [1, 16], strides = [1, 1]} : vector<3x16xf32> to vector<1x16xf32>
    %20 = vector.broadcast %19 : vector<1x16xf32> to vector<32x16xf32>
    %21 = arith.addf %17, %20 : vector<32x16xf32>
    %cst_15 = arith.constant dense<0.000000e+00> : vector<16xf32>
    %22 = vector.multi_reduction <add>, %21, %cst_15 [0] : vector<32x16xf32> to vector<16xf32>
    %23 = vector.shape_cast %22 : vector<16xf32> to vector<1x16xf32>
    %cst_16 = arith.constant 3.200000e+01 : f32
    %24 = vector.broadcast %cst_16 : f32 to vector<1x16xf32>
    %25 = arith.divf %23, %24 : vector<1x16xf32>
    %26 = vector.broadcast %25 : vector<1x16xf32> to vector<32x16xf32>
    %27 = arith.subf %21, %26 : vector<32x16xf32>
    %28 = arith.mulf %27, %27 : vector<32x16xf32>
    %cst_17 = arith.constant dense<0.000000e+00> : vector<16xf32>
    %29 = vector.multi_reduction <add>, %28, %cst_17 [0] : vector<32x16xf32> to vector<16xf32>
    %30 = vector.shape_cast %29 : vector<16xf32> to vector<1x16xf32>
    %cst_18 = arith.constant 3.200000e+01 : f32
    %31 = vector.broadcast %cst_18 : f32 to vector<1x16xf32>
    %32 = arith.divf %30, %31 : vector<1x16xf32>
    %33 = vector.broadcast %25 : vector<1x16xf32> to vector<32x16xf32>
    %34 = arith.subf %21, %33 : vector<32x16xf32>
    %cst_19 = arith.constant 9.99999974E-6 : f32
    %35 = vector.broadcast %cst_19 : f32 to vector<1x16xf32>
    %36 = arith.addf %32, %35 : vector<1x16xf32>
    %37 = math.rsqrt %36 : vector<1x16xf32>
    %38 = vector.broadcast %37 : vector<1x16xf32> to vector<32x16xf32>
    %39 = arith.mulf %34, %38 : vector<32x16xf32>
    %40 = vector.extract_strided_slice %18 {offsets = [1, 0], sizes = [1, 16], strides = [1, 1]} : vector<3x16xf32> to vector<1x16xf32>
    %41 = vector.broadcast %40 : vector<1x16xf32> to vector<32x16xf32>
    %42 = arith.mulf %39, %41 : vector<32x16xf32>
    %43 = vector.extract_strided_slice %18 {offsets = [2, 0], sizes = [1, 16], strides = [1, 1]} : vector<3x16xf32> to vector<1x16xf32>
    %44 = vector.broadcast %43 : vector<1x16xf32> to vector<32x16xf32>
    %45 = arith.addf %42, %44 : vector<32x16xf32>
    %cst_20 = arith.constant 0.000000e+00 : f32
    %46 = vector.broadcast %cst_20 : f32 to vector<32x16xf32>
    %47 = arith.maximumf %45, %46 : vector<32x16xf32>
    %48 = arith.truncf %47 : vector<32x16xf32> to vector<32x16xbf16>
    %c0_21 = arith.constant 0 : index
    %c0_22 = arith.constant 0 : index
    %49 = vector.load %arg5[%c0_21, %c0_22] : memref<96x32xbf16, #tpu.memory_space<vmem>>, vector<96x32xbf16>
    %cst_23 = arith.constant dense<0.000000e+00> : vector<96x16xf32>
    %50 = tpu.matmul %49, %48, %cst_23 {dimension_numbers = #tpu.dot_dimension_numbers<[1], [0], [0], [1], [0, 0, 1, 1], [], []>} : vector<96x32xbf16>, vector<32x16xbf16>, vector<96x16xf32> -> vector<96x16xf32>
    %51 = arith.truncf %50 : vector<96x16xf32> to vector<96x16xbf16>
    %52 = vector.extract_strided_slice %51 {offsets = [0, 0], sizes = [32, 16], strides = [1, 1]} : vector<96x16xbf16> to vector<32x16xbf16>
    %c0_24 = arith.constant 0 : index
    %c0_25 = arith.constant 0 : index
    %c0_26 = arith.constant 0 : index
    %53 = vector.load %arg6[%c0_24, %c0_25, %c0_26] : memref<3x16x16xbf16, #tpu.memory_space<vmem>>, vector<1x16x16xbf16>
    %54 = vector.shape_cast %53 : vector<1x16x16xbf16> to vector<16x16xbf16>
    %cst_27 = arith.constant dense<0.000000e+00> : vector<32x16xf32>
    %55 = tpu.matmul %52, %54, %cst_27 {dimension_numbers = #tpu.dot_dimension_numbers<[1], [0], [0], [1], [0, 0, 1, 1], [], []>} : vector<32x16xbf16>, vector<16x16xbf16>, vector<32x16xf32> -> vector<32x16xf32>
    %56 = vector.extract_strided_slice %51 {offsets = [32, 0], sizes = [32, 16], strides = [1, 1]} : vector<96x16xbf16> to vector<32x16xbf16>
    %c1_28 = arith.constant 1 : index
    %c0_29 = arith.constant 0 : index
    %c0_30 = arith.constant 0 : index
    %57 = vector.load %arg6[%c1_28, %c0_29, %c0_30] : memref<3x16x16xbf16, #tpu.memory_space<vmem>>, vector<1x16x16xbf16>
    %58 = vector.shape_cast %57 : vector<1x16x16xbf16> to vector<16x16xbf16>
    %cst_31 = arith.constant dense<0.000000e+00> : vector<32x16xf32>
    %59 = tpu.matmul %56, %58, %cst_31 {dimension_numbers = #tpu.dot_dimension_numbers<[1], [0], [0], [1], [0, 0, 1, 1], [], []>} : vector<32x16xbf16>, vector<16x16xbf16>, vector<32x16xf32> -> vector<32x16xf32>
    %60 = arith.addf %55, %59 : vector<32x16xf32>
    %61 = vector.extract_strided_slice %51 {offsets = [64, 0], sizes = [32, 16], strides = [1, 1]} : vector<96x16xbf16> to vector<32x16xbf16>
    %c2_32 = arith.constant 2 : index
    %c0_33 = arith.constant 0 : index
    %c0_34 = arith.constant 0 : index
    %62 = vector.load %arg6[%c2_32, %c0_33, %c0_34] : memref<3x16x16xbf16, #tpu.memory_space<vmem>>, vector<1x16x16xbf16>
    %63 = vector.shape_cast %62 : vector<1x16x16xbf16> to vector<16x16xbf16>
    %cst_35 = arith.constant dense<0.000000e+00> : vector<32x16xf32>
    %64 = tpu.matmul %61, %63, %cst_35 {dimension_numbers = #tpu.dot_dimension_numbers<[1], [0], [0], [1], [0, 0, 1, 1], [], []>} : vector<32x16xbf16>, vector<16x16xbf16>, vector<32x16xf32> -> vector<32x16xf32>
    %65 = arith.addf %60, %64 : vector<32x16xf32>
    %c0_36 = arith.constant 0 : index
    %c0_37 = arith.constant 0 : index
    %66 = vector.load %arg7[%c0_36, %c0_37] : memref<3x16xf32, #tpu.memory_space<vmem>>, vector<3x16xf32>
    %67 = vector.extract_strided_slice %66 {offsets = [0, 0], sizes = [1, 16], strides = [1, 1]} : vector<3x16xf32> to vector<1x16xf32>
    %68 = vector.broadcast %67 : vector<1x16xf32> to vector<32x16xf32>
    %69 = arith.addf %65, %68 : vector<32x16xf32>
    %cst_38 = arith.constant dense<0.000000e+00> : vector<16xf32>
    %70 = vector.multi_reduction <add>, %69, %cst_38 [0] : vector<32x16xf32> to vector<16xf32>
    %71 = vector.shape_cast %70 : vector<16xf32> to vector<1x16xf32>
    %cst_39 = arith.constant 3.200000e+01 : f32
    %72 = vector.broadcast %cst_39 : f32 to vector<1x16xf32>
    %73 = arith.divf %71, %72 : vector<1x16xf32>
    %74 = vector.broadcast %73 : vector<1x16xf32> to vector<32x16xf32>
    %75 = arith.subf %69, %74 : vector<32x16xf32>
    %76 = arith.mulf %75, %75 : vector<32x16xf32>
    %cst_40 = arith.constant dense<0.000000e+00> : vector<16xf32>
    %77 = vector.multi_reduction <add>, %76, %cst_40 [0] : vector<32x16xf32> to vector<16xf32>
    %78 = vector.shape_cast %77 : vector<16xf32> to vector<1x16xf32>
    %cst_41 = arith.constant 3.200000e+01 : f32
    %79 = vector.broadcast %cst_41 : f32 to vector<1x16xf32>
    %80 = arith.divf %78, %79 : vector<1x16xf32>
    %81 = vector.broadcast %73 : vector<1x16xf32> to vector<32x16xf32>
    %82 = arith.subf %69, %81 : vector<32x16xf32>
    %cst_42 = arith.constant 9.99999974E-6 : f32
    %83 = vector.broadcast %cst_42 : f32 to vector<1x16xf32>
    %84 = arith.addf %80, %83 : vector<1x16xf32>
    %85 = math.rsqrt %84 : vector<1x16xf32>
    %86 = vector.broadcast %85 : vector<1x16xf32> to vector<32x16xf32>
    %87 = arith.mulf %82, %86 : vector<32x16xf32>
    %88 = vector.extract_strided_slice %66 {offsets = [1, 0], sizes = [1, 16], strides = [1, 1]} : vector<3x16xf32> to vector<1x16xf32>
    %89 = vector.broadcast %88 : vector<1x16xf32> to vector<32x16xf32>
    %90 = arith.mulf %87, %89 : vector<32x16xf32>
    %91 = vector.extract_strided_slice %66 {offsets = [2, 0], sizes = [1, 16], strides = [1, 1]} : vector<3x16xf32> to vector<1x16xf32>
    %92 = vector.broadcast %91 : vector<1x16xf32> to vector<32x16xf32>
    %93 = arith.addf %90, %92 : vector<32x16xf32>
    %cst_43 = arith.constant 0.000000e+00 : f32
    %94 = vector.broadcast %cst_43 : f32 to vector<32x16xf32>
    %95 = arith.maximumf %93, %94 : vector<32x16xf32>
    %96 = arith.truncf %95 : vector<32x16xf32> to vector<32x16xbf16>
    %c0_44 = arith.constant 0 : index
    %c0_45 = arith.constant 0 : index
    %97 = vector.load %arg8[%c0_44, %c0_45] : memref<96x32xbf16, #tpu.memory_space<vmem>>, vector<96x32xbf16>
    %cst_46 = arith.constant dense<0.000000e+00> : vector<96x16xf32>
    %98 = tpu.matmul %97, %96, %cst_46 {dimension_numbers = #tpu.dot_dimension_numbers<[1], [0], [0], [1], [0, 0, 1, 1], [], []>} : vector<96x32xbf16>, vector<32x16xbf16>, vector<96x16xf32> -> vector<96x16xf32>
    %99 = arith.truncf %98 : vector<96x16xf32> to vector<96x16xbf16>
    %100 = vector.extract_strided_slice %99 {offsets = [0, 0], sizes = [32, 16], strides = [1, 1]} : vector<96x16xbf16> to vector<32x16xbf16>
    %c0_47 = arith.constant 0 : index
    %c0_48 = arith.constant 0 : index
    %c0_49 = arith.constant 0 : index
    %101 = vector.load %arg9[%c0_47, %c0_48, %c0_49] : memref<3x16x8xbf16, #tpu.memory_space<vmem>>, vector<1x16x8xbf16>
    %102 = vector.shape_cast %101 : vector<1x16x8xbf16> to vector<16x8xbf16>
    %cst_50 = arith.constant dense<0.000000e+00> : vector<32x8xf32>
    %103 = tpu.matmul %100, %102, %cst_50 {dimension_numbers = #tpu.dot_dimension_numbers<[1], [0], [0], [1], [0, 0, 1, 1], [], []>} : vector<32x16xbf16>, vector<16x8xbf16>, vector<32x8xf32> -> vector<32x8xf32>
    %104 = vector.extract_strided_slice %99 {offsets = [32, 0], sizes = [32, 16], strides = [1, 1]} : vector<96x16xbf16> to vector<32x16xbf16>
    %c1_51 = arith.constant 1 : index
    %c0_52 = arith.constant 0 : index
    %c0_53 = arith.constant 0 : index
    %105 = vector.load %arg9[%c1_51, %c0_52, %c0_53] : memref<3x16x8xbf16, #tpu.memory_space<vmem>>, vector<1x16x8xbf16>
    %106 = vector.shape_cast %105 : vector<1x16x8xbf16> to vector<16x8xbf16>
    %cst_54 = arith.constant dense<0.000000e+00> : vector<32x8xf32>
    %107 = tpu.matmul %104, %106, %cst_54 {dimension_numbers = #tpu.dot_dimension_numbers<[1], [0], [0], [1], [0, 0, 1, 1], [], []>} : vector<32x16xbf16>, vector<16x8xbf16>, vector<32x8xf32> -> vector<32x8xf32>
    %108 = arith.addf %103, %107 : vector<32x8xf32>
    %109 = vector.extract_strided_slice %99 {offsets = [64, 0], sizes = [32, 16], strides = [1, 1]} : vector<96x16xbf16> to vector<32x16xbf16>
    %c2_55 = arith.constant 2 : index
    %c0_56 = arith.constant 0 : index
    %c0_57 = arith.constant 0 : index
    %110 = vector.load %arg9[%c2_55, %c0_56, %c0_57] : memref<3x16x8xbf16, #tpu.memory_space<vmem>>, vector<1x16x8xbf16>
    %111 = vector.shape_cast %110 : vector<1x16x8xbf16> to vector<16x8xbf16>
    %cst_58 = arith.constant dense<0.000000e+00> : vector<32x8xf32>
    %112 = tpu.matmul %109, %111, %cst_58 {dimension_numbers = #tpu.dot_dimension_numbers<[1], [0], [0], [1], [0, 0, 1, 1], [], []>} : vector<32x16xbf16>, vector<16x8xbf16>, vector<32x8xf32> -> vector<32x8xf32>
    %113 = arith.addf %108, %112 : vector<32x8xf32>
    %c0_59 = arith.constant 0 : index
    %c0_60 = arith.constant 0 : index
    %114 = vector.load %arg10[%c0_59, %c0_60] : memref<3x8xf32, #tpu.memory_space<vmem>>, vector<3x8xf32>
    %115 = vector.extract_strided_slice %114 {offsets = [0, 0], sizes = [1, 8], strides = [1, 1]} : vector<3x8xf32> to vector<1x8xf32>
    %116 = vector.broadcast %115 : vector<1x8xf32> to vector<32x8xf32>
    %117 = arith.addf %113, %116 : vector<32x8xf32>
    %cst_61 = arith.constant dense<0.000000e+00> : vector<8xf32>
    %118 = vector.multi_reduction <add>, %117, %cst_61 [0] : vector<32x8xf32> to vector<8xf32>
    %119 = vector.shape_cast %118 : vector<8xf32> to vector<1x8xf32>
    %cst_62 = arith.constant 3.200000e+01 : f32
    %120 = vector.broadcast %cst_62 : f32 to vector<1x8xf32>
    %121 = arith.divf %119, %120 : vector<1x8xf32>
    %122 = vector.broadcast %121 : vector<1x8xf32> to vector<32x8xf32>
    %123 = arith.subf %117, %122 : vector<32x8xf32>
    %124 = arith.mulf %123, %123 : vector<32x8xf32>
    %cst_63 = arith.constant dense<0.000000e+00> : vector<8xf32>
    %125 = vector.multi_reduction <add>, %124, %cst_63 [0] : vector<32x8xf32> to vector<8xf32>
    %126 = vector.shape_cast %125 : vector<8xf32> to vector<1x8xf32>
    %cst_64 = arith.constant 3.200000e+01 : f32
    %127 = vector.broadcast %cst_64 : f32 to vector<1x8xf32>
    %128 = arith.divf %126, %127 : vector<1x8xf32>
    %129 = vector.broadcast %121 : vector<1x8xf32> to vector<32x8xf32>
    %130 = arith.subf %117, %129 : vector<32x8xf32>
    %cst_65 = arith.constant 9.99999974E-6 : f32
    %131 = vector.broadcast %cst_65 : f32 to vector<1x8xf32>
    %132 = arith.addf %128, %131 : vector<1x8xf32>
    %133 = math.rsqrt %132 : vector<1x8xf32>
    %134 = vector.broadcast %133 : vector<1x8xf32> to vector<32x8xf32>
    %135 = arith.mulf %130, %134 : vector<32x8xf32>
    %136 = vector.extract_strided_slice %114 {offsets = [1, 0], sizes = [1, 8], strides = [1, 1]} : vector<3x8xf32> to vector<1x8xf32>
    %137 = vector.broadcast %136 : vector<1x8xf32> to vector<32x8xf32>
    %138 = arith.mulf %135, %137 : vector<32x8xf32>
    %139 = vector.extract_strided_slice %114 {offsets = [2, 0], sizes = [1, 8], strides = [1, 1]} : vector<3x8xf32> to vector<1x8xf32>
    %140 = vector.broadcast %139 : vector<1x8xf32> to vector<32x8xf32>
    %141 = arith.addf %138, %140 : vector<32x8xf32>
    %cst_66 = arith.constant 0.000000e+00 : f32
    %142 = vector.broadcast %cst_66 : f32 to vector<32x8xf32>
    %143 = arith.maximumf %141, %142 : vector<32x8xf32>
    %c0_67 = arith.constant 0 : index
    %c0_68 = arith.constant 0 : index
    %144 = vector.load %arg11[%c0_67, %c0_68] : memref<32x8xf32, #tpu.memory_space<vmem>>, vector<32x8xf32>
    tpu.vector_store %arg11[%c0_67, %c0_68], %143 {strides = array<i32>} : memref<32x8xf32, #tpu.memory_space<vmem>>, vector<32x8xf32>,
    return
  }
  func.func @transform_0(%arg0: i32) -> (i32, i32) {
    %c0_i32 = arith.constant 0 : i32
    %c0_i32_0 = arith.constant 0 : i32
    %c0_i32_1 = arith.constant 0 : i32
    return %c0_i32, %c0_i32_0 : i32, i32
  }
  func.func @transform_1(%arg0: i32) -> (i32, i32) {
    %c0_i32 = arith.constant 0 : i32
    %c0_i32_0 = arith.constant 0 : i32
    %c0_i32_1 = arith.constant 0 : i32
    return %c0_i32, %c0_i32_0 : i32, i32
  }
  func.func @transform_2(%arg0: i32) -> (i32, i32, i32) {
    %c0_i32 = arith.constant 0 : i32
    %c0_i32_0 = arith.constant 0 : i32
    %c0_i32_1 = arith.constant 0 : i32
    %c0_i32_2 = arith.constant 0 : i32
    return %c0_i32, %c0_i32_0, %c0_i32_1 : i32, i32, i32
  }
  func.func @transform_3(%arg0: i32) -> (i32, i32) {
    %c0_i32 = arith.constant 0 : i32
    %c0_i32_0 = arith.constant 0 : i32
    %c0_i32_1 = arith.constant 0 : i32
    return %c0_i32, %c0_i32_0 : i32, i32
  }
  func.func @transform_4(%arg0: i32) -> (i32, i32) {
    %c0_i32 = arith.constant 0 : i32
    %c0_i32_0 = arith.constant 0 : i32
    %c0_i32_1 = arith.constant 0 : i32
    return %c0_i32, %c0_i32_0 : i32, i32
  }
  func.func @transform_5(%arg0: i32) -> (i32, i32, i32) {
    %c0_i32 = arith.constant 0 : i32
    %c0_i32_0 = arith.constant 0 : i32
    %c0_i32_1 = arith.constant 0 : i32
    %c0_i32_2 = arith.constant 0 : i32
    return %c0_i32, %c0_i32_0, %c0_i32_1 : i32, i32, i32
  }
  func.func @transform_6(%arg0: i32) -> (i32, i32) {
    %c0_i32 = arith.constant 0 : i32
    %c0_i32_0 = arith.constant 0 : i32
    %c0_i32_1 = arith.constant 0 : i32
    return %c0_i32, %c0_i32_0 : i32, i32
  }
  func.func @transform_7(%arg0: i32) -> (i32, i32) {
    %c0_i32 = arith.constant 0 : i32
    %c0_i32_0 = arith.constant 0 : i32
    %c0_i32_1 = arith.constant 0 : i32
    return %c0_i32, %c0_i32_0 : i32, i32
  }
  func.func @transform_8(%arg0: i32) -> (i32, i32, i32) {
    %c0_i32 = arith.constant 0 : i32
    %c0_i32_0 = arith.constant 0 : i32
    %c0_i32_1 = arith.constant 0 : i32
    %c0_i32_2 = arith.constant 0 : i32
    return %c0_i32, %c0_i32_0, %c0_i32_1 : i32, i32, i32
  }
  func.func @transform_9(%arg0: i32) -> (i32, i32) {
    %c0_i32 = arith.constant 0 : i32
    %c0_i32_0 = arith.constant 0 : i32
    %c0_i32_1 = arith.constant 0 : i32
    return %c0_i32, %c0_i32_0 : i32, i32
  }
  func.func @transform_10(%arg0: i32) -> (i32, i32) {
    %c0_i32 = arith.constant 0 : i32
    %c0_i32_0 = arith.constant 0 : i32
    %c0_i32_1 = arith.constant 0 : i32
    return %c0_i32, %c0_i32_0 : i32, i32
  }
}

</mosaic_0001>

<bundles_post_ra>
// kernel: dense_gcnn_block.1
= control target key start
LH: loop header
LB: loop body
LE: loop exit
PB: predicated region body
PF: predicated region fallthrough
CT: control target
= control target key end

     0   :  { %vm94_vm0 = vcmask 261120   ;;  %v420_v38 = vlaneseq  ;;  %vm428_vm1 = vcmask 130048   ;;  %vm1260_vm2 = vcmask 64512   ;;  %s1866_s0 = inlined_call_operand.vmem [shape: bf16[32,32], index: 0, kind: input, shape index: {}]   ;;  %s1867_s1 = inlined_call_operand.vmem [shape: bf16[96,32], index: 1, kind: input, shape index: {}]   ;;  %s1868_s2 = inlined_call_operand.vmem [shape: bf16[3,32,16], index: 2, kind: input, shape index: {}]   ;;  %s1869_s4 = inlined_call_operand.vmem [shape: bf16[96,32], index: 4, kind: input, shape index: {}]   ;;  %s1870_s3 = inlined_call_operand.vmem [shape: f32[3,16], index: 3, kind: input, shape index: {}]   ;;  %s1871_s5 = inlined_call_operand.vmem [shape: bf16[3,16,16], index: 5, kind: input, shape index: {}]   ;;  %s1872_s7 = inlined_call_operand.vmem [shape: bf16[96,32], index: 7, kind: input, shape index: {}]   ;;  %s1873_s6 = inlined_call_operand.vmem [shape: f32[3,16], index: 6, kind: input, shape index: {}]   ;;  %s1874_s8 = inlined_call_operand.vmem [shape: bf16[3,16,8], index: 8, kind: input, shape index: {}]   ;;  %s1875_s9 = inlined_call_operand.vmem [shape: f32[3,8], index: 9, kind: input, shape index: {}]   ;;  %s1876_s10 = inlined_call_operand.vmem [shape: f32[32,8], index: 10, kind: output, shape index: {}]  }
   0x1   :  { %v1577_v0 = vld [vmem:[%s1866_s0 + $0x8] sm:$0xff]   ;;  %v1578_v1 = vld [vmem:[%s1866_s0] sm:$0xff]   ;;  %v1581_v4 = vld [vmem:[%s1867_s1 + $0x10] sm:$0xff]  }
   0x2   :  { %1469 = vmatprep.subr.bf16.mxu0 %v1577_v0  ;;  %v1579_v2 = vld [vmem:[%s1867_s1] sm:$0xff]   ;;  %v1580_v3 = vld [vmem:[%s1867_s1 + $0x8] sm:$0xff]   ;;  %v1582_v5 = vld [vmem:[%s1867_s1 + $0x18] sm:$0xff]   ;;  %v421_v41 = vshrl.u32 %v420_v38, 7 }
   0x3   :  { %1470 = vmatpush3.bf16.msra.mxu0 %v1577_v0  ;;  %1473 = vmatprep.mubr.msk.bf16.mxu0 %vm94_vm0, %v1579_v2  ;;  %v1583_v6 = vld [vmem:[%s1867_s1 + $0x20] sm:$0xff]   ;;  %v1584_v7 = vld [vmem:[%s1867_s1 + $0x28] sm:$0xff]   ;;  %v1585_v8 = vld [vmem:[%s1868_s2 + $0x18] sm:$0xff]  }
   0x4   :  { %1471 = vmatprep.subr.bf16.mxu0 %v1578_v1  ;;  %1485 = vmatprep.subr.bf16.mxu1 %v1585_v8  ;;  %v1586_v9 = vld [vmem:[%s1868_s2 + $0x10] sm:$0xff]   ;;  %v1587_v10 = vld [vmem:[%s1868_s2 + $0x8] sm:$0xff]   ;;  %v1588_v22 = vld [vmem:[%s1868_s2] sm:$0xff]   ;;  %v1728_v45 = vsub.s32 0, %v421_v41 }
   0x5   :  { %1486 = vmatpush3.bf16.msra.mxu1 %v1585_v8  ;;  %v1589_v26 = vld [vmem:[%s1868_s2 + $0x28] sm:$0xff]   ;;  %v1590_v30 = vld [vmem:[%s1868_s2 + $0x20] sm:$0xff]  }
   0x6   :  { %1487 = vmatprep.subr.bf16.mxu1 %v1586_v9  ;;  %v1591_v32 = vld [vmem:[%s1869_s4] sm:$0xff]  }
   0x7   :  { %1472 = vmatpush3.bf16.msra.mxu0 %v1578_v1  ;;  %v419_v46 = vld [vmem:[%s1870_s3] sm:$0x7] }
   0x8   :  { %v423_v54 = vrot.slane %v419_v46, %v1728_v45 }
   0x9   :  { %1488 = vmatpush3.bf16.msra.mxu1 %v1586_v9 }
   0xa   :  { %1474 = vmatmul.mubr.msk.bf16.vlgmr.msra.gmra.mxu0 %vm94_vm0, %v1580_v3  ;;  %1493 = vmatprep.subr.bf16.mxu1 %v1587_v10 }
   0xb   :  { %1477 = vmatprep.mubr.msk.bf16.mxu0 %vm94_vm0, %v1581_v4 }
  0x12   :  { %1478 = vmatmul.mubr.msk.bf16.gmra.mxu0 %vm94_vm0, %v1582_v5 }
  0x13   :  { %1481 = vmatprep.mubr.msk.bf16.mxu0 %vm94_vm0, %v1583_v6 }
  0x1a   :  { %1482 = vmatmul.mubr.msk.bf16.gmra.mxu0 %vm94_vm0, %v1584_v7 }
  0x1b   :  { %1513 = vmatprep.mubr.msk.bf16.mxu0 %vm94_vm0, %v1591_v32 }
  0xca   :  { %v1475_v11 = vpop.f32.mrf.mxu0 }
  0xcc   :  { %v147_v12 = vpop.f32.mrf.mxu0 }
  0xce   :  { %v1476_v13 = vpop.f32.mrf.mxu0 }
  0xcf   :  { %v195_v29 = vpack.c.bf16 %v1476_v13, %v1475_v11 }
  0xd0   :  { %v150_v14 = vpop.f32.mrf.mxu0 }
  0xd1   :  { %v194_v23 = vpack.c.bf16 %v150_v14, %v147_v12 }
  0xd2   :  { %v1479_v15 = vpop.f32.mrf.mxu0 }
  0xd4   :  { %v163_v16 = vpop.f32.mrf.mxu0 }
  0xd6   :  { %v1480_v17 = vpop.f32.mrf.mxu0 }
  0xd7   :  { %v197_v20 = vpack.c.bf16 %v1480_v17, %v1479_v15 }
  0xd8   :  { %v166_v18 = vpop.f32.mrf.mxu0 }
  0xd9   :  { %v196_v19 = vpack.c.bf16 %v166_v18, %v163_v16 }
  0xda   :  { %v1483_v21 = vpop.f32.mrf.mxu0 }
  0xdb   :  { %1489 = vmatprep.mubr.msk.bf16.mxu1 %vm94_vm0, %v196_v19 }
  0xdc   :  { %1490 = vmatmul.mubr.msk.bf16.vlgmr.msra.gmra.mxu1 %vm94_vm0, %v197_v20  ;;  %v179_v24 = vpop.f32.mrf.mxu0 }
  0xdd   :  { %1494 = vmatpush3.bf16.msra.mxu1 %v1587_v10  ;;  %1497 = vmatprep.mubr.msk.bf16.mxu1 %vm94_vm0, %v194_v23 }
  0xde   :  { %v1484_v25 = vpop.f32.mrf.mxu0  ;;  %1495 = vmatprep.subr.bf16.mxu1 %v1588_v22 }
  0xdf   :  { %v199_v31 = vpack.c.bf16 %v1484_v25, %v1483_v21 }
  0xe0   :  { %v182_v27 = vpop.f32.mrf.mxu0 }
  0xe1   :  { %1496 = vmatpush3.bf16.msra.mxu1 %v1588_v22  ;;  %v198_v28 = vpack.c.bf16 %v182_v27, %v179_v24 }
  0xe2   :  { %1501 = vmatprep.subr.bf16.mxu1 %v1589_v26 }
  0xe4   :  { %1498 = vmatmul.mubr.msk.bf16.vlgmr.msra.gmra.mxu1 %vm94_vm0, %v195_v29 }
  0xe5   :  { %1502 = vmatpush3.bf16.msra.mxu1 %v1589_v26  ;;  %1505 = vmatprep.mubr.msk.bf16.mxu1 %vm94_vm0, %v198_v28 }
  0xe6   :  { %1503 = vmatprep.subr.bf16.mxu1 %v1590_v30 }
  0xe9   :  { %1504 = vmatpush3.bf16.msra.mxu1 %v1590_v30 }
  0xec   :  { %1506 = vmatmul.mubr.msk.bf16.vlgmr.msra.gmra.mxu1 %vm94_vm0, %v199_v31 }
 0x19c   :  { %v1491_v33 = vpop.f32.mrf.mxu1 }
 0x19e   :  { %v261_v34 = vpop.f32.mrf.mxu1 }
 0x1a0   :  { %v1492_v35 = vpop.f32.mrf.mxu1 }
 0x1a2   :  { %v264_v36 = vpop.f32.mrf.mxu1 }
 0x1a4   :  { %v1499_v37 = vpop.f32.mrf.mxu1 }
 0x1a5   :  { %v337_v48 = vadd.f32 %v1499_v37, %v1491_v33 }
 0x1a6   :  { %v328_v39 = vpop.f32.mrf.mxu1 }
 0x1a7   :  { %v329_v44 = vadd.f32 %v328_v39, %v261_v34 }
 0x1a8   :  { %v1500_v40 = vpop.f32.mrf.mxu1 }
 0x1a9   :  { %v340_v51 = vadd.f32 %v1500_v40, %v1492_v35  ;;  %v1742_v35 = vsub.s32 1, %v421_v41 }
 0x1aa   :  { %v331_v42 = vpop.f32.mrf.mxu1 }
 0x1ab   :  { %v332_v52 = vadd.f32 %v331_v42, %v264_v36  ;;  %v1744_v36 = vsub.s32 2, %v421_v41  ;;  %v475_v37 = vrot.slane %v419_v46, %v1742_v35 }
 0x1ac   :  { %v1507_v43 = vpop.f32.mrf.mxu1 }
 0x1ad   :  { %v417_v53 = vadd.f32 %v1507_v43, %v337_v48  ;;  %v483_v39 = vrot.slane %v419_v46, %v1744_v36  ;;  %v1592_v46 = vld [vmem:[%s1869_s4 + $0x8] sm:$0xff]  }
 0x1ae   :  { %v400_v47 = vpop.f32.mrf.mxu1 }
 0x1af   :  { %v415_v49 = vadd.f32 %v400_v47, %v329_v44  ;;  %v426_v59 = vadd.f32 %v423_v54, %v417_v53 }
 0x1b0   :  { %v1508_v50 = vpop.f32.mrf.mxu1 }
 0x1b1   :  { %v424_v56 = vadd.f32 %v423_v54, %v415_v49  ;;  %v418_v57 = vadd.f32 %v1508_v50, %v340_v51  ;;  %v432_v1 = vsel %vm428_vm1, %v426_v59, 0.0 }
 0x1b2   :  { %v403_v55 = vpop.f32.mrf.mxu1 }
 0x1b3   :  { %v416_v58 = vadd.f32 %v403_v55, %v332_v52  ;;  %v429_v61 = vsel %vm428_vm1, %v424_v56, 0.0  ;;  %v427_v62 = vadd.f32 %v423_v54, %v418_v57 }
 0x1b5   :  { %v425_v60 = vadd.f32 %v423_v54, %v416_v58  ;;  %v434_v3 = vsel %vm428_vm1, %v427_v62, 0.0 }
 0x1b7   :  { %v430_v63 = vsel %vm428_vm1, %v425_v60, 0.0 }
 0x1b8   :  { %v431_v0 = vadd.f32 %v430_v63, %v429_v61  ;;  %v1594_v61 = vld [vmem:[%s1869_s4 + $0x18] sm:$0xff]   ;;  %v1596_v63 = vld [vmem:[%s1869_s4 + $0x28] sm:$0xff]  }
 0x1ba   :  { %v433_v2 = vadd.f32 %v432_v1, %v431_v0  ;;  %v1597_v0 = vld [vmem:[%s1871_s5 + $0x8] sm:$0xff]   ;;  %v1598_v1 = vld [vmem:[%s1871_s5] sm:$0xff]  }
 0x1bb   :  { %1525 = vmatprep.subr.bf16.mxu1 %v1597_v0 }
 0x1bc   :  { %v435_v4 = vadd.f32 %v434_v3, %v433_v2  ;;  %1526 = vmatpush3.bf16.msra.mxu1 %v1597_v0 }
 0x1bd   :  { %1531 = vmatprep.subr.bf16.mxu1 %v1598_v1 }
 0x1be   :  { %v436_v5 = vrot.slane %v435_v4, 4 }
 0x1c0   :  { %v437_v6 = vadd.f32 %v436_v5, %v435_v4 }
 0x1c2   :  { %v438_v7 = vrot.slane %v437_v6, 2 }
 0x1c4   :  { %v439_v8 = vadd.f32 %v438_v7, %v437_v6 }
 0x1c6   :  { %v440_v9 = vrot.slane %v439_v8, 1 }
 0x1c8   :  { %v441_v10 = vadd.f32 %v440_v9, %v439_v8 }
 0x1ca   :  { %v443_v11 = vmul.f32 0.03125, %v441_v10 }
 0x1cc   :  { %v444_v12 = vsub.f32 %v424_v56, %v443_v11  ;;  %v445_v13 = vsub.f32 %v425_v60, %v443_v11  ;;  %v446_v14 = vsub.f32 %v426_v59, %v443_v11  ;;  %v447_v15 = vsub.f32 %v427_v62, %v443_v11  ;;  %v1593_v60 = vld [vmem:[%s1869_s4 + $0x10] sm:$0xff]   ;;  %v1595_v62 = vld [vmem:[%s1869_s4 + $0x20] sm:$0xff]  }
 0x1ce   :  { %v448_v16 = vmul.f32 %v444_v12, %v444_v12  ;;  %v449_v17 = vmul.f32 %v445_v13, %v445_v13  ;;  %v450_v18 = vmul.f32 %v446_v14, %v446_v14  ;;  %v451_v19 = vmul.f32 %v447_v15, %v447_v15 }
 0x1d0   :  { %v452_v20 = vsel %vm428_vm1, %v448_v16, 0.0  ;;  %v453_v21 = vsel %vm428_vm1, %v449_v17, 0.0  ;;  %v455_v23 = vsel %vm428_vm1, %v450_v18, 0.0  ;;  %v457_v25 = vsel %vm428_vm1, %v451_v19, 0.0 }
 0x1d1   :  { %v454_v22 = vadd.f32 %v453_v21, %v452_v20  ;;  %v1600_v21 = vld [vmem:[%s1872_s7] sm:$0xff]  }
 0x1d3   :  { %v456_v24 = vadd.f32 %v455_v23, %v454_v22 }
 0x1d5   :  { %v458_v26 = vadd.f32 %v457_v25, %v456_v24 }
 0x1d7   :  { %v459_v27 = vrot.slane %v458_v26, 4 }
 0x1d9   :  { %v460_v28 = vadd.f32 %v459_v27, %v458_v26 }
 0x1db   :  { %v461_v29 = vrot.slane %v460_v28, 2 }
 0x1dd   :  { %v462_v30 = vadd.f32 %v461_v29, %v460_v28 }
 0x1df   :  { %v463_v31 = vrot.slane %v462_v30, 1 }
 0x1e1   :  { %v464_v32 = vadd.f32 %v463_v31, %v462_v30 }
 0x1e3   :  { %v465_v33 = vmul.f32 0.03125, %v464_v32  ;;  %v836_v32 = vld [vmem:[%s1873_s6] sm:$0x7] }
 0x1e5   :  { %v466_v34 = vadd.f32 1e-05, %v465_v33 }
 0x1e7   :  { %1609 = vrsqrt.f32 %v466_v34 }
 0x1f4   :  { %v1610_v38 = vpop.eup %1609 }
 0x1f5   :  { %v469_v40 = vmul.f32 %v1610_v38, %v445_v13  ;;  %v470_v42 = vmul.f32 %v1610_v38, %v446_v14  ;;  %v471_v43 = vmul.f32 %v1610_v38, %v447_v15  ;;  %v468_v44 = vmul.f32 %v1610_v38, %v444_v12  ;;  %v1599_v13 = vld [vmem:[%s1871_s5 + $0x10] sm:$0xff]  }
 0x1f7   :  { %v478_v47 = vmul.f32 %v475_v37, %v470_v42  ;;  %v479_v48 = vmul.f32 %v475_v37, %v471_v43  ;;  %v476_v49 = vmul.f32 %v475_v37, %v468_v44  ;;  %v477_v50 = vmul.f32 %v475_v37, %v469_v40 }
 0x1f8   :  { %v840_v43 = vrot.slane %v836_v32, %v1728_v45 }
 0x1f9   :  { %v486_v51 = vadd.f32 %v483_v39, %v478_v47  ;;  %v487_v52 = vadd.f32 %v483_v39, %v479_v48  ;;  %v484_v53 = vadd.f32 %v483_v39, %v476_v49  ;;  %v485_v54 = vadd.f32 %v483_v39, %v477_v50 }
 0x1fb   :  { %v490_v55 = vmax.f32 %v486_v51, 0.0  ;;  %v491_v41 = vmax.f32 %v487_v52, 0.0  ;;  %v488_v56 = vmax.f32 %v484_v53, 0.0  ;;  %v489_v57 = vmax.f32 %v485_v54, 0.0 }
 0x1fd   :  { %v493_v58 = vpack.c.bf16 %v491_v41, %v490_v55  ;;  %v492_v59 = vpack.c.bf16 %v489_v57, %v488_v56 }
 0x1ff   :  { %1509 = vmatprep.subr.bf16.mxu0 %v493_v58 }
 0x200   :  { %1510 = vmatpush3.bf16.msra.mxu0 %v493_v58 }
 0x201   :  { %1511 = vmatprep.subr.bf16.mxu0 %v492_v59 }
 0x204   :  { %1512 = vmatpush3.bf16.msra.mxu0 %v492_v59 }
 0x207   :  { %1514 = vmatmul.mubr.msk.bf16.vlgmr.msra.gmra.mxu0 %vm94_vm0, %v1592_v46 }
 0x208   :  { %1517 = vmatprep.mubr.msk.bf16.mxu0 %vm94_vm0, %v1593_v60 }
 0x20f   :  { %1518 = vmatmul.mubr.msk.bf16.gmra.mxu0 %vm94_vm0, %v1594_v61 }
 0x210   :  { %1521 = vmatprep.mubr.msk.bf16.mxu0 %vm94_vm0, %v1595_v62 }
 0x217   :  { %1522 = vmatmul.mubr.msk.bf16.gmra.mxu0 %vm94_vm0, %v1596_v63 }
 0x218   :  { %1547 = vmatprep.mubr.msk.bf16.mxu0 %vm94_vm0, %v1600_v21 }
 0x2c7   :  { %v1515_v2 = vpop.f32.mrf.mxu0 }
 0x2c9   :  { %v588_v3 = vpop.f32.mrf.mxu0 }
 0x2cb   :  { %v1516_v4 = vpop.f32.mrf.mxu0 }
 0x2cc   :  { %v636_v19 = vpack.c.bf16 %v1516_v4, %v1515_v2 }
 0x2cd   :  { %v591_v5 = vpop.f32.mrf.mxu0 }
 0x2ce   :  { %v635_v14 = vpack.c.bf16 %v591_v5, %v588_v3 }
 0x2cf   :  { %v1519_v6 = vpop.f32.mrf.mxu0 }
 0x2d1   :  { %v604_v7 = vpop.f32.mrf.mxu0 }
 0x2d3   :  { %v1520_v8 = vpop.f32.mrf.mxu0 }
 0x2d4   :  { %v638_v11 = vpack.c.bf16 %v1520_v8, %v1519_v6 }
 0x2d5   :  { %v607_v9 = vpop.f32.mrf.mxu0 }
 0x2d6   :  { %v637_v10 = vpack.c.bf16 %v607_v9, %v604_v7 }
 0x2d7   :  { %v1523_v12 = vpop.f32.mrf.mxu0 }
 0x2d8   :  { %1527 = vmatprep.mubr.msk.bf16.mxu1 %vm428_vm1, %v637_v10 }
 0x2d9   :  { %1528 = vmatmul.mubr.msk.bf16.vlgmr.msra.gmra.mxu1 %vm428_vm1, %v638_v11  ;;  %v620_v15 = vpop.f32.mrf.mxu0 }
 0x2da   :  { %1533 = vmatprep.mubr.msk.bf16.mxu1 %vm428_vm1, %v635_v14  ;;  %1532 = vmatpush3.bf16.msra.mxu1 %v1598_v1 }
 0x2db   :  { %v1524_v16 = vpop.f32.mrf.mxu0  ;;  %1537 = vmatprep.subr.bf16.mxu1 %v1599_v13 }
 0x2dc   :  { %v640_v20 = vpack.c.bf16 %v1524_v16, %v1523_v12 }
 0x2dd   :  { %v623_v17 = vpop.f32.mrf.mxu0 }
 0x2de   :  { %v639_v18 = vpack.c.bf16 %v623_v17, %v620_v15 }
 0x2e1   :  { %1534 = vmatmul.mubr.msk.bf16.vlgmr.msra.gmra.mxu1 %vm428_vm1, %v636_v19 }
 0x2e2   :  { %1539 = vmatprep.mubr.msk.bf16.mxu1 %vm428_vm1, %v639_v18  ;;  %1538 = vmatpush3.bf16.msra.mxu1 %v1599_v13 }
 0x2e9   :  { %1540 = vmatmul.mubr.msk.bf16.vlgmr.msra.gmra.mxu1 %vm428_vm1, %v640_v20 }
 0x399   :  { %v1529_v22 = vpop.f32.mrf.mxu1 }
 0x39b   :  { %v692_v23 = vpop.f32.mrf.mxu1 }
 0x39d   :  { %v1530_v24 = vpop.f32.mrf.mxu1 }
 0x39f   :  { %v695_v25 = vpop.f32.mrf.mxu1 }
 0x3a1   :  { %v1535_v26 = vpop.f32.mrf.mxu1 }
 0x3a2   :  { %v762_v34 = vadd.f32 %v1535_v26, %v1529_v22  ;;  %v898_v26 = vrot.slane %v836_v32, %v1744_v36 }
 0x3a3   :  { %v753_v27 = vpop.f32.mrf.mxu1 }
 0x3a4   :  { %v754_v31 = vadd.f32 %v753_v27, %v692_v23 }
 0x3a5   :  { %v1536_v28 = vpop.f32.mrf.mxu1 }
 0x3a6   :  { %v765_v39 = vadd.f32 %v1536_v28, %v1530_v24  ;;  %v890_v24 = vrot.slane %v836_v32, %v1742_v35  ;;  %v1601_v32 = vld [vmem:[%s1872_s7 + $0x8] sm:$0xff]  }
 0x3a7   :  { %v756_v29 = vpop.f32.mrf.mxu1 }
 0x3a8   :  { %v757_v40 = vadd.f32 %v756_v29, %v695_v25 }
 0x3a9   :  { %v1541_v30 = vpop.f32.mrf.mxu1 }
 0x3aa   :  { %v834_v42 = vadd.f32 %v1541_v30, %v762_v34 }
 0x3ab   :  { %v817_v33 = vpop.f32.mrf.mxu1 }
 0x3ac   :  { %v832_v37 = vadd.f32 %v817_v33, %v754_v31  ;;  %v843_v50 = vadd.f32 %v840_v43, %v834_v42 }
 0x3ad   :  { %v1542_v38 = vpop.f32.mrf.mxu1 }
 0x3ae   :  { %v841_v47 = vadd.f32 %v840_v43, %v832_v37  ;;  %v835_v48 = vadd.f32 %v1542_v38, %v765_v39  ;;  %v848_v41 = vsel %vm428_vm1, %v843_v50, 0.0 }
 0x3af   :  { %v820_v44 = vpop.f32.mrf.mxu1 }
 0x3b0   :  { %v833_v49 = vadd.f32 %v820_v44, %v757_v40  ;;  %v845_v52 = vsel %vm428_vm1, %v841_v47, 0.0  ;;  %v844_v53 = vadd.f32 %v840_v43, %v835_v48 }
 0x3b2   :  { %v842_v51 = vadd.f32 %v840_v43, %v833_v49  ;;  %v850_v57 = vsel %vm428_vm1, %v844_v53, 0.0 }
 0x3b4   :  { %v846_v54 = vsel %vm428_vm1, %v842_v51, 0.0 }
 0x3b5   :  { %v847_v55 = vadd.f32 %v846_v54, %v845_v52  ;;  %v1603_v52 = vld [vmem:[%s1872_s7 + $0x18] sm:$0xff]   ;;  %v1605_v54 = vld [vmem:[%s1872_s7 + $0x28] sm:$0xff]  }
 0x3b7   :  { %v849_v56 = vadd.f32 %v848_v41, %v847_v55  ;;  %v1606_v55 = vld [vmem:[%s1874_s8 + $0x8] sm:$0xff]   ;;  %v1607_v41 = vld [vmem:[%s1874_s8] sm:$0xff]  }
 0x3b8   :  { %1559 = vmatprep.subr.bf16.mxu1 %v1606_v55 }
 0x3b9   :  { %v851_v58 = vadd.f32 %v850_v57, %v849_v56  ;;  %1560 = vmatpush3.bf16.msra.mxu1 %v1606_v55 }
 0x3ba   :  { %1565 = vmatprep.subr.bf16.mxu1 %v1607_v41 }
 0x3bb   :  { %v852_v59 = vrot.slane %v851_v58, 4 }
 0x3bd   :  { %v853_v46 = vadd.f32 %v852_v59, %v851_v58 }
 0x3bf   :  { %v854_v60 = vrot.slane %v853_v46, 2 }
 0x3c1   :  { %v855_v61 = vadd.f32 %v854_v60, %v853_v46 }
 0x3c3   :  { %v856_v62 = vrot.slane %v855_v61, 1 }
 0x3c5   :  { %v857_v63 = vadd.f32 %v856_v62, %v855_v61 }
 0x3c7   :  { %v858_v0 = vmul.f32 0.03125, %v857_v63 }
 0x3c9   :  { %v859_v1 = vsub.f32 %v841_v47, %v858_v0  ;;  %v860_v2 = vsub.f32 %v842_v51, %v858_v0  ;;  %v861_v3 = vsub.f32 %v843_v50, %v858_v0  ;;  %v862_v4 = vsub.f32 %v844_v53, %v858_v0  ;;  %v1602_v51 = vld [vmem:[%s1872_s7 + $0x10] sm:$0xff]   ;;  %v1604_v53 = vld [vmem:[%s1872_s7 + $0x20] sm:$0xff]  }
 0x3cb   :  { %v863_v5 = vmul.f32 %v859_v1, %v859_v1  ;;  %v864_v6 = vmul.f32 %v860_v2, %v860_v2  ;;  %v865_v7 = vmul.f32 %v861_v3, %v861_v3  ;;  %v866_v8 = vmul.f32 %v862_v4, %v862_v4 }
 0x3cd   :  { %v867_v9 = vsel %vm428_vm1, %v863_v5, 0.0  ;;  %v868_v10 = vsel %vm428_vm1, %v864_v6, 0.0  ;;  %v870_v12 = vsel %vm428_vm1, %v865_v7, 0.0  ;;  %v872_v14 = vsel %vm428_vm1, %v866_v8, 0.0 }
 0x3ce   :  { %v869_v11 = vadd.f32 %v868_v10, %v867_v9 }
 0x3d0   :  { %v871_v13 = vadd.f32 %v870_v12, %v869_v11 }
 0x3d2   :  { %v873_v15 = vadd.f32 %v872_v14, %v871_v13 }
 0x3d4   :  { %v874_v16 = vrot.slane %v873_v15, 4 }
 0x3d6   :  { %v875_v17 = vadd.f32 %v874_v16, %v873_v15 }
 0x3d8   :  { %v876_v18 = vrot.slane %v875_v17, 2 }
 0x3da   :  { %v877_v19 = vadd.f32 %v876_v18, %v875_v17 }
 0x3dc   :  { %v878_v20 = vrot.slane %v877_v19, 1 }
 0x3de   :  { %v879_v21 = vadd.f32 %v878_v20, %v877_v19  ;;  %v1251_v20 = vld [vmem:[%s1875_s9] sm:$0x7] }
 0x3e0   :  { %v880_v22 = vmul.f32 0.03125, %v879_v21 }
 0x3e2   :  { %v881_v23 = vadd.f32 1e-05, %v880_v22 }
 0x3e4   :  { %1611 = vrsqrt.f32 %v881_v23 }
 0x3f1   :  { %v1612_v25 = vpop.eup %1611 }
 0x3f2   :  { %v884_v27 = vmul.f32 %v1612_v25, %v860_v2  ;;  %v885_v28 = vmul.f32 %v1612_v25, %v861_v3  ;;  %v886_v29 = vmul.f32 %v1612_v25, %v862_v4  ;;  %v883_v30 = vmul.f32 %v1612_v25, %v859_v1  ;;  %v1608_v2 = vld [vmem:[%s1874_s8 + $0x10] sm:$0xff]  }
 0x3f4   :  { %v893_v31 = vmul.f32 %v890_v24, %v885_v28  ;;  %v894_v33 = vmul.f32 %v890_v24, %v886_v29  ;;  %v891_v34 = vmul.f32 %v890_v24, %v883_v30  ;;  %v892_v37 = vmul.f32 %v890_v24, %v884_v27 }
 0x3f5   :  { %v1255_v28 = vrot.slane %v1251_v20, %v1728_v45 }
 0x3f6   :  { %v901_v38 = vadd.f32 %v898_v26, %v893_v31  ;;  %v902_v39 = vadd.f32 %v898_v26, %v894_v33  ;;  %v899_v40 = vadd.f32 %v898_v26, %v891_v34  ;;  %v900_v42 = vadd.f32 %v898_v26, %v892_v37 }
 0x3f8   :  { %v905_v43 = vmax.f32 %v901_v38, 0.0  ;;  %v906_v44 = vmax.f32 %v902_v39, 0.0  ;;  %v903_v47 = vmax.f32 %v899_v40, 0.0  ;;  %v904_v48 = vmax.f32 %v900_v42, 0.0 }
 0x3fa   :  { %v908_v49 = vpack.c.bf16 %v906_v44, %v905_v43  ;;  %v907_v50 = vpack.c.bf16 %v904_v48, %v903_v47 }
 0x3fc   :  { %1543 = vmatprep.subr.bf16.mxu0 %v908_v49 }
 0x3fd   :  { %1544 = vmatpush3.bf16.msra.mxu0 %v908_v49 }
 0x3fe   :  { %1545 = vmatprep.subr.bf16.mxu0 %v907_v50 }
 0x401   :  { %1546 = vmatpush3.bf16.msra.mxu0 %v907_v50 }
 0x404   :  { %1548 = vmatmul.mubr.msk.bf16.vlgmr.msra.gmra.mxu0 %vm94_vm0, %v1601_v32 }
 0x405   :  { %1551 = vmatprep.mubr.msk.bf16.mxu0 %vm94_vm0, %v1602_v51 }
 0x40c   :  { %1552 = vmatmul.mubr.msk.bf16.gmra.mxu0 %vm94_vm0, %v1603_v52 }
 0x40d   :  { %1555 = vmatprep.mubr.msk.bf16.mxu0 %vm94_vm0, %v1604_v53 }
 0x414   :  { %1556 = vmatmul.mubr.msk.bf16.gmra.mxu0 %vm94_vm0, %v1605_v54 }
 0x4c4   :  { %v1549_v56 = vpop.f32.mrf.mxu0 }
 0x4c6   :  { %v1003_v57 = vpop.f32.mrf.mxu0 }
 0x4c8   :  { %v1550_v58 = vpop.f32.mrf.mxu0 }
 0x4c9   :  { %v1051_v8 = vpack.c.bf16 %v1550_v58, %v1549_v56 }
 0x4ca   :  { %v1006_v59 = vpop.f32.mrf.mxu0 }
 0x4cb   :  { %v1050_v3 = vpack.c.bf16 %v1006_v59, %v1003_v57 }
 0x4cc   :  { %v1553_v46 = vpop.f32.mrf.mxu0 }
 0x4ce   :  { %v1019_v60 = vpop.f32.mrf.mxu0 }
 0x4d0   :  { %v1554_v61 = vpop.f32.mrf.mxu0 }
 0x4d1   :  { %v1053_v0 = vpack.c.bf16 %v1554_v61, %v1553_v46 }
 0x4d2   :  { %v1022_v62 = vpop.f32.mrf.mxu0 }
 0x4d3   :  { %v1052_v63 = vpack.c.bf16 %v1022_v62, %v1019_v60 }
 0x4d4   :  { %v1557_v1 = vpop.f32.mrf.mxu0 }
 0x4d5   :  { %1561 = vmatprep.mubr.msk.bf16.mxu1 %vm428_vm1, %v1052_v63 }
 0x4d6   :  { %1562 = vmatmul.mubr.msk.bf16.vlgmr.msra.gmra.mxu1 %vm428_vm1, %v1053_v0  ;;  %v1035_v4 = vpop.f32.mrf.mxu0 }
 0x4d7   :  { %1567 = vmatprep.mubr.msk.bf16.mxu1 %vm428_vm1, %v1050_v3  ;;  %1566 = vmatpush3.bf16.msra.mxu1 %v1607_v41 }
 0x4d8   :  { %v1558_v5 = vpop.f32.mrf.mxu0  ;;  %1571 = vmatprep.subr.bf16.mxu1 %v1608_v2 }
 0x4d9   :  { %v1055_v9 = vpack.c.bf16 %v1558_v5, %v1557_v1 }
 0x4da   :  { %v1038_v6 = vpop.f32.mrf.mxu0 }
 0x4db   :  { %v1054_v7 = vpack.c.bf16 %v1038_v6, %v1035_v4 }
 0x4de   :  { %1568 = vmatmul.mubr.msk.bf16.vlgmr.msra.gmra.mxu1 %vm428_vm1, %v1051_v8 }
 0x4df   :  { %1572 = vmatpush3.bf16.msra.mxu1 %v1608_v2  ;;  %1573 = vmatprep.mubr.msk.bf16.mxu1 %vm428_vm1, %v1054_v7 }
 0x4e6   :  { %1574 = vmatmul.mubr.msk.bf16.vlgmr.msra.gmra.mxu1 %vm428_vm1, %v1055_v9 }
 0x596   :  { %v1563_v10 = vpop.f32.mrf.mxu1 }
 0x598   :  { %v1107_v11 = vpop.f32.mrf.mxu1 }
 0x59a   :  { %v1564_v12 = vpop.f32.mrf.mxu1 }
 0x59c   :  { %v1110_v13 = vpop.f32.mrf.mxu1 }
 0x59e   :  { %v1569_v14 = vpop.f32.mrf.mxu1 }
 0x59f   :  { %v1177_v22 = vadd.f32 %v1569_v14, %v1563_v10 }
 0x5a0   :  { %v1168_v15 = vpop.f32.mrf.mxu1 }
 0x5a1   :  { %v1169_v19 = vadd.f32 %v1168_v15, %v1107_v11  ;;  %v1306_v11 = vrot.slane %v1251_v20, %v1742_v35 }
 0x5a2   :  { %v1570_v16 = vpop.f32.mrf.mxu1 }
 0x5a3   :  { %v1180_v25 = vadd.f32 %v1570_v16, %v1564_v12 }
 0x5a4   :  { %v1171_v17 = vpop.f32.mrf.mxu1 }
 0x5a5   :  { %v1172_v26 = vadd.f32 %v1171_v17, %v1110_v13  ;;  %v1314_v13 = vrot.slane %v1251_v20, %v1744_v36 }
 0x5a6   :  { %v1575_v18 = vpop.f32.mrf.mxu1 }
 0x5a7   :  { %v1249_v27 = vadd.f32 %v1575_v18, %v1177_v22 }
 0x5a8   :  { %v1232_v21 = vpop.f32.mrf.mxu1 }
 0x5a9   :  { %v1247_v23 = vadd.f32 %v1232_v21, %v1169_v19  ;;  %v1258_v34 = vadd.f32 %v1255_v28, %v1249_v27 }
 0x5aa   :  { %v1576_v24 = vpop.f32.mrf.mxu1 }
 0x5ab   :  { %v1256_v30 = vadd.f32 %v1255_v28, %v1247_v23  ;;  %v1250_v31 = vadd.f32 %v1576_v24, %v1180_v25  ;;  %v1264_v43 = vsel %vm1260_vm2, %v1258_v34, 0.0 }
 0x5ac   :  { %v1235_v29 = vpop.f32.mrf.mxu1 }
 0x5ad   :  { %v1248_v33 = vadd.f32 %v1235_v29, %v1172_v26  ;;  %v1261_v38 = vsel %vm1260_vm2, %v1256_v30, 0.0  ;;  %v1259_v39 = vadd.f32 %v1255_v28, %v1250_v31 }
 0x5af   :  { %v1257_v37 = vadd.f32 %v1255_v28, %v1248_v33  ;;  %v1266_v47 = vsel %vm1260_vm2, %v1259_v39, 0.0 }
 0x5b1   :  { %v1262_v40 = vsel %vm1260_vm2, %v1257_v37, 0.0 }
 0x5b2   :  { %v1263_v42 = vadd.f32 %v1262_v40, %v1261_v38 }
 0x5b4   :  { %v1265_v44 = vadd.f32 %v1264_v43, %v1263_v42 }
 0x5b6   :  { %v1267_v48 = vadd.f32 %v1266_v47, %v1265_v44 }
 0x5b8   :  { %v1268_v45 = vrot.slane %v1267_v48, 4 }
 0x5ba   :  { %v1269_v49 = vadd.f32 %v1268_v45, %v1267_v48 }
 0x5bc   :  { %v1270_v50 = vrot.slane %v1269_v49, 2 }
 0x5be   :  { %v1271_v32 = vadd.f32 %v1270_v50, %v1269_v49 }
 0x5c0   :  { %v1272_v51 = vrot.slane %v1271_v32, 1 }
 0x5c2   :  { %v1273_v52 = vadd.f32 %v1272_v51, %v1271_v32 }
 0x5c4   :  { %v1274_v53 = vmul.f32 0.03125, %v1273_v52 }
 0x5c6   :  { %v1275_v54 = vsub.f32 %v1256_v30, %v1274_v53  ;;  %v1276_v55 = vsub.f32 %v1257_v37, %v1274_v53  ;;  %v1277_v41 = vsub.f32 %v1258_v34, %v1274_v53  ;;  %v1278_v56 = vsub.f32 %v1259_v39, %v1274_v53 }
 0x5c8   :  { %v1279_v57 = vmul.f32 %v1275_v54, %v1275_v54  ;;  %v1280_v58 = vmul.f32 %v1276_v55, %v1276_v55  ;;  %v1281_v59 = vmul.f32 %v1277_v41, %v1277_v41  ;;  %v1282_v46 = vmul.f32 %v1278_v56, %v1278_v56 }
 0x5ca   :  { %v1283_v60 = vsel %vm1260_vm2, %v1279_v57, 0.0  ;;  %v1284_v61 = vsel %vm1260_vm2, %v1280_v58, 0.0  ;;  %v1286_v63 = vsel %vm1260_vm2, %v1281_v59, 0.0  ;;  %v1288_v1 = vsel %vm1260_vm2, %v1282_v46, 0.0 }
 0x5cb   :  { %v1285_v62 = vadd.f32 %v1284_v61, %v1283_v60 }
 0x5cd   :  { %v1287_v0 = vadd.f32 %v1286_v63, %v1285_v62 }
 0x5cf   :  { %v1289_v2 = vadd.f32 %v1288_v1, %v1287_v0 }
 0x5d1   :  { %v1290_v3 = vrot.slane %v1289_v2, 4 }
 0x5d3   :  { %v1291_v4 = vadd.f32 %v1290_v3, %v1289_v2 }
 0x5d5   :  { %v1292_v5 = vrot.slane %v1291_v4, 2 }
 0x5d7   :  { %v1293_v6 = vadd.f32 %v1292_v5, %v1291_v4 }
 0x5d9   :  { %v1294_v7 = vrot.slane %v1293_v6, 1 }
 0x5db   :  { %v1295_v8 = vadd.f32 %v1294_v7, %v1293_v6 }
 0x5dd   :  { %v1296_v9 = vmul.f32 0.03125, %v1295_v8 }
 0x5df   :  { %v1297_v10 = vadd.f32 1e-05, %v1296_v9 }
 0x5e1   :  { %1613 = vrsqrt.f32 %v1297_v10 }
 0x5ee   :  { %v1614_v12 = vpop.eup %1613 }
 0x5ef   :  { %v1299_v14 = vmul.f32 %v1614_v12, %v1275_v54  ;;  %v1300_v15 = vmul.f32 %v1614_v12, %v1276_v55  ;;  %v1301_v16 = vmul.f32 %v1614_v12, %v1277_v41  ;;  %v1302_v17 = vmul.f32 %v1614_v12, %v1278_v56 }
 0x5f1   :  { %v1307_v18 = vmul.f32 %v1306_v11, %v1299_v14  ;;  %v1308_v19 = vmul.f32 %v1306_v11, %v1300_v15  ;;  %v1309_v21 = vmul.f32 %v1306_v11, %v1301_v16  ;;  %v1310_v22 = vmul.f32 %v1306_v11, %v1302_v17 }
 0x5f3   :  { %v1315_v23 = vadd.f32 %v1314_v13, %v1307_v18  ;;  %v1316_v24 = vadd.f32 %v1314_v13, %v1308_v19  ;;  %v1317_v25 = vadd.f32 %v1314_v13, %v1309_v21  ;;  %v1318_v26 = vadd.f32 %v1314_v13, %v1310_v22 }
 0x5f5   :  { %v1319_v27 = vmax.f32 %v1315_v23, 0.0  ;;  %v1320_v28 = vmax.f32 %v1316_v24, 0.0  ;;  %v1321_v29 = vmax.f32 %v1317_v25, 0.0  ;;  %v1322_v30 = vmax.f32 %v1318_v26, 0.0 }
 0x5f7   :  { %1323 = vst.msk [vmem:[%s1876_s10] sm:$0xff] %vm1260_vm2, %v1319_v27  ;;  %1324 = vst.msk [vmem:[%s1876_s10 + $0x8] sm:$0xff] %vm1260_vm2, %v1320_v28 }
 0x5f8   :  { %1325 = vst.msk [vmem:[%s1876_s10 + $0x10] sm:$0xff] %vm1260_vm2, %v1321_v29  ;;  %1326 = vst.msk [vmem:[%s1876_s10 + $0x18] sm:$0xff] %vm1260_vm2, %v1322_v30 }

</bundles_post_ra>
